<compile_context>
chip_gen: v5e
topology: v5e:2x2
jax: 0.10.0
libtpu: 0.0.40
codegen_flags: <defaults>
</compile_context>

<pallas_src>
import functools

import jax
import jax.numpy as jnp
from jax import lax
from jax.experimental import pallas as pl
from jax.experimental.pallas import tpu as pltpu


# --------------------------------------------------------------------------
# Phase 1: argmax over the candidate axis (reads estimated_value only)
# --------------------------------------------------------------------------
def _argmax_kernel(ev_ref, idx_ref, m_sc, i_sc, *, n_total):
    # ev_ref : (tb, tn)  native dtype (N on lanes)
    # idx_ref: (tb, 1)   int32 output (resident across the N axis)
    # m_sc   : (tb, 1)   f32   running max
    # i_sc   : (tb, 1)   int32 running argmax (first occurrence)
    n_step = pl.program_id(1)

    @pl.when(n_step == 0)
    def _():
        m_sc[...] = jnp.full_like(m_sc, -jnp.inf)
        i_sc[...] = jnp.zeros_like(i_sc)

    ev = ev_ref[...].astype(jnp.float32)          # in-kernel cast, hidden under DMA
    tb, tn = ev.shape
    local = lax.broadcasted_iota(jnp.int32, (tb, tn), 1)
    gcol = local + n_step * tn
    # Mask lanes beyond N (tail N-block padding would otherwise read garbage).
    ev = jnp.where(gcol < n_total, ev, -jnp.inf)

    blk_max = jnp.max(ev, axis=1, keepdims=True)                       # (tb, 1)
    blk_idx = jnp.min(jnp.where(ev == blk_max, gcol, n_total),
                      axis=1, keepdims=True)                           # (tb, 1)

    better = blk_max > m_sc[...]      # strict > keeps the first occurrence
    i_sc[...] = jnp.where(better, blk_idx, i_sc[...])
    m_sc[...] = jnp.where(better, blk_max, m_sc[...])

    @pl.when(n_step == pl.num_programs(1) - 1)
    def _():
        idx_ref[...] = i_sc[...]


# --------------------------------------------------------------------------
# Phase 2: gather the winning (1, A) action rows via per-row manual DMA
# --------------------------------------------------------------------------
def _gather_kernel(idx_ref, act_hbm, out_ref, buf, sem, *, b_total, tb):
    # idx_ref: (B,) int32 in SMEM (scalar prefetch)
    # act_hbm: (B, N, A) raw HBM ref (memory_space=pl.ANY)
    # out_ref: (tb, A)   buf: (tb, A) VMEM scratch   sem: DMA sems, shape (tb,)
    bb = pl.program_id(0)
    copies = []
    for r in range(tb):                                   # static unroll, tb small
        b = jnp.minimum(bb * tb + r, b_total - 1)         # clamp padded tail rows
        row = idx_ref[b]
        cp = pltpu.make_async_copy(act_hbm.at[b, pl.ds(row, 1), :],   # (1, A) HBM
                                   buf.at[pl.ds(r, 1), :],            # (1, A) VMEM
                                   sem.at[r])
        cp.start()
        copies.append(cp)
    for cp in copies:
        cp.wait()
    out_ref[...] = buf[...]


# --------------------------------------------------------------------------
# Tiling helpers
# --------------------------------------------------------------------------
def _round8(x: int) -> int:
    return max(8, (x // 8) * 8)


def _vmem_budget():
    """(tile budget, vmem_limit_bytes) derived from the chip's VMEM capacity."""
    try:
        cap = pltpu.get_tpu_info().vmem_capacity_bytes
    except Exception:
        cap = 64 * 1024 * 1024          # conservative fallback (v7x-sized)
    budget = max(8 << 20, int(cap * 0.35))     # ~45 MiB on v5e/v6e, ~22 MiB on v7x
    limit = max(32 << 20, int(cap * 0.70))     # raise scoped limit, stay < physical
    return budget, limit


def _phase1_tiles(B: int, N: int, ev_bytes: int, budget: int):
    max_tn = 4096                                # multiple of 128
    tn = N if N <= max_tn else max_tn
    if B <= 8:
        return B, tn
    per_row = 2 * tn * ev_bytes + 4096           # dbl-buffered ev tile + idx/scratch pad
    tb = max(8, budget // per_row)
    if B >= 16:
        tb = min(tb, _round8((B + 1) // 2))      # keep >= 2 blocks for 2-TC v7x
    tb = _round8(min(tb, B))
    return tb, tn


def _gather_tile(B: int) -> int:
    if B < 8:
        return B
    if B >= 16:
        return min(32, _round8((B + 1) // 2))    # >= 2 blocks, bounded DMA unroll
    return 8


# --------------------------------------------------------------------------
# Wrapper
# --------------------------------------------------------------------------
def planning_module(estimated_value: jax.Array, action: jax.Array) -> jax.Array:
    """estimated_value: (B, N, 1), action: (B, N, A) -> (B, A)."""
    B, N, A = action.shape
    assert estimated_value.shape == (B, N, 1)

    # Trailing-singleton squeeze only (pure metadata, no HBM relayout).
    ev2d = estimated_value[..., 0]                       # (B, N), native dtype

    budget, vmem_limit = _vmem_budget()
    tb, tn = _phase1_tiles(B, N, ev2d.dtype.itemsize, budget)

    # ---- Phase 1: per-row argmax indices ---------------------------------
    idx2d = pl.pallas_call(
        functools.partial(_argmax_kernel, n_total=N),
        out_shape=jax.ShapeDtypeStruct((B, 1), jnp.int32),
        grid_spec=pltpu.PrefetchScalarGridSpec(
            num_scalar_prefetch=0,
            grid=(pl.cdiv(B, tb), pl.cdiv(N, tn)),
            in_specs=[pl.BlockSpec((tb, tn), lambda b, n: (b, n))],
            out_specs=pl.BlockSpec((tb, 1), lambda b, n: (b, 0)),
            scratch_shapes=[pltpu.VMEM((tb, 1), jnp.float32),
                            pltpu.VMEM((tb, 1), jnp.int32)]),
        compiler_params=pltpu.CompilerParams(
            dimension_semantics=("parallel", "arbitrary"),
            vmem_limit_bytes=vmem_limit),
    )(ev2d)

    idx1d = idx2d[:, 0]                                  # (B,) int32 for SMEM prefetch

    # ---- Phase 2: gather only the winning rows of `action` ---------------
    tbg = _gather_tile(B)
    out = pl.pallas_call(
        functools.partial(_gather_kernel, b_total=B, tb=tbg),
        out_shape=jax.ShapeDtypeStruct((B, A), action.dtype),
        grid_spec=pltpu.PrefetchScalarGridSpec(
            num_scalar_prefetch=1,
            grid=(pl.cdiv(B, tbg),),
            in_specs=[pl.BlockSpec(memory_space=pl.ANY)],   # action stays in HBM
            out_specs=pl.BlockSpec((tbg, A), lambda b, idx: (b, 0)),
            scratch_shapes=[pltpu.VMEM((tbg, A), action.dtype),
                            pltpu.SemaphoreType.DMA((tbg,))]),
        compiler_params=pltpu.CompilerParams(
            dimension_semantics=("parallel",),
            vmem_limit_bytes=vmem_limit),
    )(idx1d, action)
    return out


if __name__ == "__main__":
    key = jax.random.PRNGKey(0)
    k1, k2 = jax.random.split(key)

    # Small, lane-friendly shapes: batch=16, candidates=128, action dim=4.
    B, N, A = 16, 128, 4
    estimated_value = jax.random.normal(k1, (B, N, 1), dtype=jnp.float32)
    action = jax.random.normal(k2, (B, N, A), dtype=jnp.float32)

    out = planning_module(estimated_value, action)
    out = jax.block_until_ready(out)

    # Reference check in plain JAX (mirrors the PyTorch forward).
    ref_idx = jnp.argmax(estimated_value[..., 0], axis=-1)              # (B,)
    ref = jnp.take_along_axis(action, ref_idx[:, None, None], axis=1)[:, 0, :]
    assert out.shape == (B, A)
    assert jnp.array_equal(out, ref), (out, ref)

    print("KERNEL_OK")
</pallas_src>

<mosaic_0001>
module attributes {stable_mosaic.version = 11 : i64} {
  func.func @_argmax_kernel(%arg0: i32, %arg1: i32, %arg2: memref<8x128xf32, #tpu.memory_space<vmem>>, %arg3: memref<8x1xi32, #tpu.memory_space<vmem>>, %arg4: memref<8x1xf32, #tpu.memory_space<vmem>>, %arg5: memref<8x1xi32, #tpu.memory_space<vmem>>) attributes {dimension_semantics = [#tpu.dimension_semantics<parallel>, #tpu.dimension_semantics<arbitrary>], iteration_bounds = array<i64: 2, 1>, scalar_prefetch = 0 : i64, scratch_operands = 2 : i64, tpu.core_type = #tpu.core_type<tc>, window_params = [{transform_indices = @transform_0, window_bounds = array<i64: 8, 128>}, {transform_indices = @transform_1, window_bounds = array<i64: 8, 1>}]} {
    %c0_i32 = arith.constant 0 : i32
    %0 = arith.cmpi eq, %arg1, %c0_i32 : i32
    %1 = arith.extui %0 : i1 to i32
    %c0_i32_0 = arith.constant 0 : i32
    %2 = arith.cmpi ne, %1, %c0_i32_0 : i32
    scf.if %2 {
      %cst_18 = arith.constant 0xFF800000 : f32
      %31 = vector.broadcast %cst_18 : f32 to vector<8x1xf32>
      %c0_19 = arith.constant 0 : index
      %c0_20 = arith.constant 0 : index
      %32 = vector.load %arg4[%c0_19, %c0_20] : memref<8x1xf32, #tpu.memory_space<vmem>>, vector<8x1xf32>
      tpu.vector_store %arg4[%c0_19, %c0_20], %31 {strides = array<i32>} : memref<8x1xf32, #tpu.memory_space<vmem>>, vector<8x1xf32>,
      %c0_i32_21 = arith.constant 0 : i32
      %33 = vector.broadcast %c0_i32_21 : i32 to vector<8x1xi32>
      %c0_22 = arith.constant 0 : index
      %c0_23 = arith.constant 0 : index
      %34 = vector.load %arg5[%c0_22, %c0_23] : memref<8x1xi32, #tpu.memory_space<vmem>>, vector<8x1xi32>
      tpu.vector_store %arg5[%c0_22, %c0_23], %33 {strides = array<i32>} : memref<8x1xi32, #tpu.memory_space<vmem>>, vector<8x1xi32>,
    } else {
    }
    %c0 = arith.constant 0 : index
    %c0_1 = arith.constant 0 : index
    %3 = vector.load %arg2[%c0, %c0_1] : memref<8x128xf32, #tpu.memory_space<vmem>>, vector<8x128xf32>
    %4 = tpu.iota {dimensions = array<i32: 1>} : vector<8x128xi32>
    %c128_i32 = arith.constant 128 : i32
    %5 = arith.muli %arg1, %c128_i32 : i32
    %6 = vector.broadcast %5 : i32 to vector<8x128xi32>
    %7 = arith.addi %4, %6 : vector<8x128xi32>
    %c128_i32_2 = arith.constant 128 : i32
    %8 = vector.broadcast %c128_i32_2 : i32 to vector<8x128xi32>
    %9 = arith.cmpi slt, %7, %8 : vector<8x128xi32>
    %cst = arith.constant 0xFF800000 : f32
    %10 = vector.broadcast %cst : f32 to vector<8x128xf32>
    %11 = arith.select %9, %3, %10 : vector<8x128xi1>, vector<8x128xf32>
    %cst_3 = arith.constant dense<0xFF800000> : vector<8xf32>
    %12 = vector.multi_reduction <maximumf>, %11, %cst_3 [1] : vector<8x128xf32> to vector<8xf32>
    %13 = vector.shape_cast %12 : vector<8xf32> to vector<8x1xf32>
    %14 = vector.broadcast %13 : vector<8x1xf32> to vector<8x128xf32>
    %15 = arith.cmpf oeq, %11, %14 : vector<8x128xf32>
    %c128_i32_4 = arith.constant 128 : i32
    %16 = vector.broadcast %c128_i32_4 : i32 to vector<8x128xi32>
    %17 = arith.select %15, %7, %16 : vector<8x128xi1>, vector<8x128xi32>
    %cst_5 = arith.constant dense<2147483647> : vector<8xi32>
    %18 = vector.multi_reduction <minsi>, %17, %cst_5 [1] : vector<8x128xi32> to vector<8xi32>
    %19 = vector.shape_cast %18 : vector<8xi32> to vector<8x1xi32>
    %c0_6 = arith.constant 0 : index
    %c0_7 = arith.constant 0 : index
    %20 = vector.load %arg4[%c0_6, %c0_7] : memref<8x1xf32, #tpu.memory_space<vmem>>, vector<8x1xf32>
    %21 = arith.cmpf ogt, %13, %20 : vector<8x1xf32>
    %c0_8 = arith.constant 0 : index
    %c0_9 = arith.constant 0 : index
    %22 = vector.load %arg5[%c0_8, %c0_9] : memref<8x1xi32, #tpu.memory_space<vmem>>, vector<8x1xi32>
    %23 = arith.select %21, %19, %22 : vector<8x1xi1>, vector<8x1xi32>
    %c0_10 = arith.constant 0 : index
    %c0_11 = arith.constant 0 : index
    %24 = vector.load %arg5[%c0_10, %c0_11] : memref<8x1xi32, #tpu.memory_space<vmem>>, vector<8x1xi32>
    tpu.vector_store %arg5[%c0_10, %c0_11], %23 {strides = array<i32>} : memref<8x1xi32, #tpu.memory_space<vmem>>, vector<8x1xi32>,
    %c0_12 = arith.constant 0 : index
    %c0_13 = arith.constant 0 : index
    %25 = vector.load %arg4[%c0_12, %c0_13] : memref<8x1xf32, #tpu.memory_space<vmem>>, vector<8x1xf32>
    %26 = arith.select %21, %13, %25 : vector<8x1xi1>, vector<8x1xf32>
    %c0_14 = arith.constant 0 : index
    %c0_15 = arith.constant 0 : index
    %27 = vector.load %arg4[%c0_14, %c0_15] : memref<8x1xf32, #tpu.memory_space<vmem>>, vector<8x1xf32>
    tpu.vector_store %arg4[%c0_14, %c0_15], %26 {strides = array<i32>} : memref<8x1xf32, #tpu.memory_space<vmem>>, vector<8x1xf32>,
    %c0_i32_16 = arith.constant 0 : i32
    %28 = arith.cmpi eq, %arg1, %c0_i32_16 : i32
    %29 = arith.extui %28 : i1 to i32
    %c0_i32_17 = arith.constant 0 : i32
    %30 = arith.cmpi ne, %29, %c0_i32_17 : i32
    scf.if %30 {
      %c0_18 = arith.constant 0 : index
      %c0_19 = arith.constant 0 : index
      %31 = vector.load %arg5[%c0_18, %c0_19] : memref<8x1xi32, #tpu.memory_space<vmem>>, vector<8x1xi32>
      %c0_20 = arith.constant 0 : index
      %c0_21 = arith.constant 0 : index
      %32 = vector.load %arg3[%c0_20, %c0_21] : memref<8x1xi32, #tpu.memory_space<vmem>>, vector<8x1xi32>
      tpu.vector_store %arg3[%c0_20, %c0_21], %31 {strides = array<i32>} : memref<8x1xi32, #tpu.memory_space<vmem>>, vector<8x1xi32>,
    } else {
    }
    return
  }
  func.func @transform_0(%arg0: i32, %arg1: i32) -> (i32, i32) {
    %c0_i32 = arith.constant 0 : i32
    return %arg0, %arg1 : i32, i32
  }
  func.func @transform_1(%arg0: i32, %arg1: i32) -> (i32, i32) {
    %c0_i32 = arith.constant 0 : i32
    %c0_i32_0 = arith.constant 0 : i32
    return %arg0, %c0_i32 : i32, i32
  }
}

</mosaic_0001>

<bundles_post_ra>
// kernel: tpu_custom_call.1
= control target key start
LH: loop header
LB: loop body
LE: loop exit
PB: predicated region body
PF: predicated region fallthrough
CT: control target
= control target key end

     0   :  { %6 = vsyncpa [#allocation5], 0  ;;  %s527_s0 = inlined_call_operand.hbm [shape: f32[16,128], index: 0, kind: input, shape index: {}]   ;;  %s528_s1 = inlined_call_operand.vmem [shape: s32[16,1], index: 1, kind: output, shape index: {}]  }
   0x1   :  { %8 = vsyncpa [#allocation5 + $0x1], 0  ;;  %s432_s6 = smov 0   ;;  %s434_s7 = smov 0  }
   0x2   :  { %s436_s8 = smov 0   ;;  %s438_s9 = smov 0  }
   0x3   :  { %s440_s10 = smov 0   ;;  %s442_s11 = smov 0  }
   0x4 LB: > { %s270_s12 = sadd.s32 4294967295, %s418_s11   ;;  %s26_s13 = sadd.s32 1, %s414_s10  ;;  %s418_s11 = sphi %s442_s11, %s14_s11   ;;  %s414_s10 = sphi %s440_s10, %s535_s10   ;;  %s410_s9 = sphi %s438_s9, %s534_s9   ;;  %s406_s8 = sphi %s436_s8, %s533_s8   ;;  %s402_s7 = sphi %s434_s7, %s532_s7   ;;  %s398_s6 = sphi %s432_s6, %s531_s6  }
   0x5   : > { %p28_p0 = scmp.ge.s32.totalorder %s26_s13, 2  ;;  %s35_s14 = sadd.s32 1, %s406_s8 }
   0x6   : > { %p42_p1 = scmp.ne.s32.totalorder %s406_s8, %s402_s7  ;;  %p43_p2 = scmp.eq.s32.totalorder %s418_s11, 0 }
   0x7   : > { %s537_s13 = smov (%p28_p0, %s26_s13), 0  ;;  %p48_p4 = scmp.ne.s32.totalorder %s402_s7, %s398_s6 }
   0x8   : > { %p468_p3 = por %p43_p2, %p42_p1  ;;  %s30_s16 = ssub.s32 %s414_s10, %s537_s13 }
   0x9   : > { %p49_p5 = scmp.eq.s32.totalorder %s270_s12, 0  ;;  %p33_p6 = scmp.eq.s32.totalorder %s30_s16, 0 }
   0xa   : > { %p287_p8 = scmp.lt.s32.totalorder %s418_s11, 2  ;;  %s98_s19 = sand.u32 1, %s406_s8  }
   0xb   : > { %p475_p7 = por %p49_p5, %p48_p4  ;;  %s275_s20 = sshll.u32 %s414_s10, 3 }
   0xc   : > { %s481_s18 = scalar_select %p33_p6, %s406_s8, %s35_s14  }
   0xd   : > { %s274_s21 = sshll.u32 %s98_s19, 3  ;;  %s107_s24 = scalar_lea.hbm %s527_s0, %s275_s20 }
   0xe   : > { %s109_s25 = sshll.u32 %s107_s24, 4  ;;  %s102_s26 = scalar_lea.vmem [#allocation4], %s274_s21  ;;  %s110_s25 = int_to_ptr.hbm [resolvable:$true] %s109_s25 }
   0xf   : > { %s111_s27 = sshll.u32 %s102_s26, 4  ;;  %p284_p9 = pnand %p287_p8, %p468_p3  ;;  %s112_s27 = int_to_ptr.vmem [resolvable:$true] %s111_s27 }
  0x10   : > { %p276_p10 = scmp.ge.s32.totalorder %s418_s11, 1  ;;  %p116_p11 = scmp.lt.s32.totalorder %s418_s11, 3 }
  0x11   : > { %s99_s28 = scalar_lea.sflag [#allocation5], %s98_s19 }
  0x12   : > { %286 = dma.hbm_to_vmem [thread:$0]  (!%p284_p9), %s110_s25, 128, %s112_s27, %s99_s28  }
  0x13   : > { %p117_p12 = pnand %p276_p10, %p116_p11 }
  0x14   : > { %s122_s29 = sand.u32 (!%p117_p12), 1, %s402_s7  }
  0x15   : > { %120 = sbr.rel (%p117_p12) target bundleno = 398 (0x18e), region = 24  ;;  %s277_s30 = sshll.u32 (!%p117_p12), %s122_s29, 3 }
  0x16   : > { %s123_s2 = scalar_lea.sflag (!%p117_p12), [#allocation5], %s122_s29  ;;  %s126_s3 = scalar_lea.vmem (!%p117_p12), [#allocation4], %s277_s30 }
  0x1a   : > { %393 = dma.done.wait (%p475_p7), %s123_s2, 128  }
  0x1b   : > { %395 = vsyncadd (%p475_p7), %s123_s2, 4294967168  ;;  %vm153_vm0 = vcmask 7168   ;;  %v420_v0 = vmov -inf   ;;  %v156_v1 = vld [vmem:[%s126_s3] sm:$0xff]  ;;  %v157_v2 = vlaneseq  ;;  %v421_v10 = vmov 0   ;;  %p145_p13 = scmp.lt.s32.totalorder %s410_s9, 1 }
  0x1c   : > { %154 = vst.msk [vmem:[#allocation2] sm:$0xff] %vm153_vm0, %v420_v0  ;;  %164 = vmax.xlane.f32.xlu0 %v156_v1 }
  0x1d   : > { %v158_v4 = vand.u32 127, %v157_v2  ;;  %155 = vst.msk [vmem:[#allocation3] sm:$0xff] %vm153_vm0, %v421_v10  ;;  %s539_s9 = smov (!%p145_p13, %s410_s9), 1 }
  0x1e   : > { %s278_s4 = sshll.u32 %s539_s9, 3 }
  0x1f   : > { %s148_s12 = scalar_lea.vmem %s528_s1, %s278_s4 }
  0x23   : > { %v182_v3 = vld [vmem:[#allocation2] sm:$0xff] }
  0x24   : > { %v184_v19 = vld [vmem:[#allocation3] sm:$0xff] }
  0x8f   : > { %v165_v5 = vpop.xlane.xlu0 %164 }
  0x90   : > { %vm166_vm1 = vcmp.eq.f32.partialorder %v156_v1, %v165_v5  ;;  %vm183_vm2 = vcmp.gt.f32.partialorder %v165_v5, %v182_v3 }
  0x91   : > { %v189_v6 = vsel %vm183_vm2, %v165_v5, %v182_v3  ;;  %v167_v7 = vsel %vm166_vm1, %v158_v4, 128 }
  0x92   : > { %190 = vst.msk [vmem:[#allocation2] sm:$0xff] %vm153_vm0, %v189_v6  ;;  %v169_v8 = vshra.s32 %v167_v7, 16  ;;  %v168_v11 = vand.u32 65535, %v167_v7 }
  0x94   : > { %v171_v9 = vcvt.s32.f32 %v169_v8  ;;  %v170_v13 = vcvt.s32.f32 %v168_v11 }
  0x96   : > { %172 = vmin.xlane.f32.xlu0 %v171_v9 }
 0x109   : > { %v173_v12 = vpop.xlane.xlu0 %172 }
 0x10a   : > { %vm174_vm3 = vcmp.eq.f32.partialorder %v171_v9, %v173_v12  ;;  %v179_v15 = vcvt.f32.s32 %v173_v12 }
 0x10b   : > { %v175_v14 = vsel %vm174_vm3, %v170_v13, inf }
 0x10c   : > { %176 = vmin.xlane.f32.xlu1 %v175_v14  ;;  %v180_v17 = vshll.u32 %v179_v15, 16 }
 0x17f   : > { %v177_v16 = vpop.xlane.xlu1 %176 }
 0x180   : > { %v178_v18 = vcvt.f32.s32 %v177_v16 }
 0x182   : > { %v181_v20 = vadd.s32 %v180_v17, %v178_v18 }
 0x184   : > { %v185_v21 = vsel %vm183_vm2, %v181_v20, %v184_v19 }
 0x185   : > { %187 = vst.msk [vmem:[#allocation3] sm:$0xff] %vm153_vm0, %v185_v21 }
 0x18c   : > { %v194_v22 = vld [vmem:[#allocation3] sm:$0xff] }
 0x18d   : > { %195 = vst.msk [vmem:[%s148_s12] sm:$0xff] %vm153_vm0, %v194_v22 }
 0x18e PF: > { %s14_s11 = sadd.s32 1, %s418_s11   ;;  %s531_s6 = smov %s402_s7 }
 0x18f   : > { %p11_p0 = scmp.ge.s32.totalorder %s14_s11, 4   ;;  %s532_s7 = smov %s406_s8 }
 0x190   : > { %s533_s8 = smov %s481_s18  ;;  %s534_s9 = smov %s414_s10 }
 0x191   : > { %s535_s10 = smov %s537_s13  ;;  %13 = sbr.rel (!%p11_p0) target bundleno = 4 (0x4), region = 72 }
 0x196   :  { %215 = vsyncpa [#allocation5], 1 }
 0x197   :  { %217 = vsyncpa [#allocation5 + $0x1], 1 }

</bundles_post_ra>
